<compile_context>
chip_gen: v5e
topology: v5e:2x2
jax: 0.10.0
libtpu: 0.0.40
codegen_flags: <defaults>
</compile_context>

<pallas_src>
import jax
import jax.numpy as jnp
from jax.experimental import pallas as pl
from jax.experimental.pallas import tpu as pltpu


def _conv_unext_ag_kernel(x_ref, skip_ref,
                          w2_ref, b2_ref,
                          w3_ref, b3_ref,
                          wa_ref, ba_ref,
                          wg1_ref,
                          ws_ref, bs_ref,
                          o_ref):
    """One (C, tile_L) channel-major tile of the fused gate/attention math."""
    x = x_ref[...].astype(jnp.float32)          # (C, tL)
    skip = skip_ref[...].astype(jnp.float32)    # (C, tL)

    # Gate branches x2 / x3: consumed immediately -> low live-register set.
    x2 = jnp.dot(w2_ref[...], x, preferred_element_type=jnp.float32) + b2_ref[...]
    x3 = jnp.dot(w3_ref[...], x, preferred_element_type=jnp.float32) + b3_ref[...]
    u = jax.nn.sigmoid(x2) * jnp.tanh(x3)

    # a = sigmoid(Wg1 @ (x1 + skip) + bg1), refactored host-side so the two
    # projections below are independent (no serial MXU dependency).
    pre_a = (jnp.dot(wa_ref[...], x, preferred_element_type=jnp.float32)
             + jnp.dot(wg1_ref[...], skip, preferred_element_type=jnp.float32)
             + ba_ref[...])
    a = jax.nn.sigmoid(pre_a)

    s = a * skip + u

    out = jnp.dot(ws_ref[...], s, preferred_element_type=jnp.float32) + bs_ref[...]
    o_ref[...] = out.astype(o_ref.dtype)


def _pick_tile_l(L, C, budget_bytes):
    """Largest lane tile that divides L, is a multiple of 128 (or full extent)
    and fits the per-step VMEM budget."""
    # Per spatial column: x/skip/out double-buffered (3*2) + ~8 f32 temps.
    per_col = (3 * 2 + 8) * C * 4
    max_l = max(128, budget_bytes // per_col)
    if L <= max_l or L % 128 != 0:
        return L                       # single full-extent tile (always legal)
    t = min((max_l // 128) * 128, L)
    while t > 128 and L % t != 0:
        t -= 128
    return t


def conv_unext_ag_pallas(x, skip_x, params, *, tile_l=None,
                         vmem_budget_bytes=16 * 1024 * 1024):
    """x, skip_x: NCHW arrays.  params: PyTorch-layout (out, in) weights."""
    Wg, bg, Wg1, bg1, Ws, bs = (params[k] for k in
                                ("gate_w", "gate_b", "g1_w", "g1_b",
                                 "skip_w", "skip_b"))
    B, C, H, W = x.shape
    L = H * W

    # Channel-major reshape: contiguous, no HBM transpose traffic.
    x_cm = x.reshape(B, C, L)
    s_cm = skip_x.reshape(B, C, L)

    # PyTorch gate output feature f = c*3 + k (from reshape(..., C, 3)); split
    # the (3C, C) weight into per-gate (C, C) matrices with a pure reshape.
    f32 = jnp.float32
    Wg3 = Wg.astype(f32).reshape(C, 3, C)                   # [c_out, gate, c_in]
    w1, w2, w3 = Wg3[:, 0, :], Wg3[:, 1, :], Wg3[:, 2, :]
    bg3 = bg.astype(f32).reshape(C, 3)
    b1, b2, b3 = bg3[:, 0:1], bg3[:, 1:2], bg3[:, 2:3]      # (C, 1) each
    wg1 = Wg1.astype(f32)                                    # (out, in), as-is
    ws = Ws.astype(f32)
    bs_c = bs.astype(f32).reshape(C, 1)

    # Host-side fold of linear_g1 over gate branch 1 (see header comment).
    wa = wg1 @ w1                                            # (C, C)
    ba = wg1 @ b1 + bg1.astype(f32).reshape(C, 1)            # (C, 1)

    if tile_l is None:
        tile_l = _pick_tile_l(L, C, vmem_budget_bytes)
    assert L % tile_l == 0
    grid = (B, L // tile_l)

    # Explicit VMEM sizing: double-buffered data blocks + weights + f32 temps.
    block_bytes = 3 * C * tile_l * 4 * 2
    weight_bytes = (4 * C * C + 4 * C) * 4 * 2
    temp_bytes = 8 * C * tile_l * 4
    vmem_limit = int(min(max(2 * (block_bytes + weight_bytes + temp_bytes),
                             32 * 1024 * 1024),
                         48 * 1024 * 1024))

    data_spec = pl.BlockSpec((None, C, tile_l), lambda b, l: (b, 0, l))
    # Constant index maps -> weights/biases are fetched to VMEM once and stay
    # resident across the whole grid.
    # TODO(synk): at large C, single-buffer the resident weights to halve their
    # VMEM footprint (default BlockSpec pipelining still allocates two buffers).
    wspec = pl.BlockSpec((C, C), lambda b, l: (0, 0))
    bspec = pl.BlockSpec((C, 1), lambda b, l: (0, 0))

    out_cm = pl.pallas_call(
        _conv_unext_ag_kernel,
        out_shape=jax.ShapeDtypeStruct((B, C, L), x.dtype),
        grid_spec=pltpu.PrefetchScalarGridSpec(
            num_scalar_prefetch=0,
            grid=grid,
            in_specs=[
                data_spec, data_spec,   # x, skip (channel-major tiles)
                wspec, bspec,           # gate branch 2
                wspec, bspec,           # gate branch 3
                wspec, bspec,           # folded (Wg1@W1, Wg1@b1 + bg1)
                wspec,                  # linear_g1 weight (applied to skip)
                wspec, bspec,           # linear_skip
            ],
            out_specs=data_spec,
        ),
        compiler_params=pltpu.CompilerParams(
            dimension_semantics=("parallel", "parallel"),
            vmem_limit_bytes=vmem_limit),
    )(x_cm, s_cm, w2, b2, w3, b3, wa, ba, wg1, ws, bs_c)

    return out_cm.reshape(B, C, H, W)


def conv_unext_ag_reference(x, skip_x, params):
    """Pure-JAX mirror of the PyTorch forward (for correctness check)."""
    Wg, bg, Wg1, bg1, Ws, bs = (params[k] for k in
                                ("gate_w", "gate_b", "g1_w", "g1_b",
                                 "skip_w", "skip_b"))
    x = jnp.transpose(x, (0, 2, 3, 1))
    skip_x = jnp.transpose(skip_x, (0, 2, 3, 1))
    g = x @ Wg.T + bg                               # (B,H,W,3C)
    g = g.reshape(*x.shape, 3)                      # (B,H,W,C,3)
    x1, x2, x3 = jnp.moveaxis(g, -1, 0)
    skip_x = (jax.nn.sigmoid((x1 + skip_x) @ Wg1.T + bg1) * skip_x
              + jax.nn.sigmoid(x2) * jnp.tanh(x3))
    skip_x = skip_x @ Ws.T + bs
    return jnp.transpose(skip_x, (0, 3, 1, 2))


def make_params(key, in_channels):
    """Deterministic synthetic parameters in PyTorch (out, in) layout."""
    C = in_channels
    keys = jax.random.split(key, 6)
    return {
        "gate_w": jax.random.normal(keys[0], (3 * C, C), jnp.float32) * 0.2,
        "gate_b": jax.random.normal(keys[1], (3 * C,), jnp.float32) * 0.1,
        "g1_w":   jax.random.normal(keys[2], (C, C), jnp.float32) * 0.2,
        "g1_b":   jax.random.normal(keys[3], (C,), jnp.float32) * 0.1,
        "skip_w": jax.random.normal(keys[4], (C, C), jnp.float32) * 0.2,
        "skip_b": jax.random.normal(keys[5], (C,), jnp.float32) * 0.1,
    }


if __name__ == "__main__":
    B, C, H, W = 2, 4, 16, 16          # small shapes; L = H*W = 256 lanes/tile

    root = jax.random.PRNGKey(0)
    kx, ks, kp = jax.random.split(root, 3)
    x = jax.random.normal(kx, (B, C, H, W), jnp.float32)
    skip_x = jax.random.normal(ks, (B, C, H, W), jnp.float32)
    params = make_params(kp, C)

    out = conv_unext_ag_pallas(x, skip_x, params)
    out = jax.block_until_ready(out)

    ref = jax.block_until_ready(conv_unext_ag_reference(x, skip_x, params))
    if not jnp.allclose(out, ref, atol=1e-3, rtol=1e-3):
        raise AssertionError("Pallas kernel output does not match reference")

    print("KERNEL_OK")
</pallas_src>

<mosaic_0001>
module attributes {stable_mosaic.version = 11 : i64} {
  func.func @_conv_unext_ag_kernel(%arg0: i32, %arg1: i32, %arg2: memref<1x4x256xf32, #tpu.memory_space<vmem>>, %arg3: memref<1x4x256xf32, #tpu.memory_space<vmem>>, %arg4: memref<4x4xf32, #tpu.memory_space<vmem>>, %arg5: memref<4x1xf32, #tpu.memory_space<vmem>>, %arg6: memref<4x4xf32, #tpu.memory_space<vmem>>, %arg7: memref<4x1xf32, #tpu.memory_space<vmem>>, %arg8: memref<4x4xf32, #tpu.memory_space<vmem>>, %arg9: memref<4x1xf32, #tpu.memory_space<vmem>>, %arg10: memref<4x4xf32, #tpu.memory_space<vmem>>, %arg11: memref<4x4xf32, #tpu.memory_space<vmem>>, %arg12: memref<4x1xf32, #tpu.memory_space<vmem>>, %arg13: memref<1x4x256xf32, #tpu.memory_space<vmem>>) attributes {dimension_semantics = [#tpu.dimension_semantics<parallel>, #tpu.dimension_semantics<parallel>], iteration_bounds = array<i64: 2, 1>, scalar_prefetch = 0 : i64, scratch_operands = 0 : i64, tpu.core_type = #tpu.core_type<tc>, window_params = [{transform_indices = @transform_0, window_bounds = array<i64: 1, 4, 256>}, {transform_indices = @transform_1, window_bounds = array<i64: 1, 4, 256>}, {pipeline_mode = #tpu.pipeline_mode<synchronous>, transform_indices = @transform_2, window_bounds = array<i64: 4, 4>}, {pipeline_mode = #tpu.pipeline_mode<synchronous>, transform_indices = @transform_3, window_bounds = array<i64: 4, 1>}, {pipeline_mode = #tpu.pipeline_mode<synchronous>, transform_indices = @transform_4, window_bounds = array<i64: 4, 4>}, {pipeline_mode = #tpu.pipeline_mode<synchronous>, transform_indices = @transform_5, window_bounds = array<i64: 4, 1>}, {pipeline_mode = #tpu.pipeline_mode<synchronous>, transform_indices = @transform_6, window_bounds = array<i64: 4, 4>}, {pipeline_mode = #tpu.pipeline_mode<synchronous>, transform_indices = @transform_7, window_bounds = array<i64: 4, 1>}, {pipeline_mode = #tpu.pipeline_mode<synchronous>, transform_indices = @transform_8, window_bounds = array<i64: 4, 4>}, {pipeline_mode = #tpu.pipeline_mode<synchronous>, transform_indices = @transform_9, window_bounds = array<i64: 4, 4>}, {pipeline_mode = #tpu.pipeline_mode<synchronous>, transform_indices = @transform_10, window_bounds = array<i64: 4, 1>}, {transform_indices = @transform_11, window_bounds = array<i64: 1, 4, 256>}]} {
    %c0 = arith.constant 0 : index
    %c0_0 = arith.constant 0 : index
    %c0_1 = arith.constant 0 : index
    %0 = vector.load %arg2[%c0, %c0_0, %c0_1] : memref<1x4x256xf32, #tpu.memory_space<vmem>>, vector<1x4x256xf32>
    %1 = vector.shape_cast %0 : vector<1x4x256xf32> to vector<4x256xf32>
    %c0_2 = arith.constant 0 : index
    %c0_3 = arith.constant 0 : index
    %c0_4 = arith.constant 0 : index
    %2 = vector.load %arg3[%c0_2, %c0_3, %c0_4] : memref<1x4x256xf32, #tpu.memory_space<vmem>>, vector<1x4x256xf32>
    %3 = vector.shape_cast %2 : vector<1x4x256xf32> to vector<4x256xf32>
    %c0_5 = arith.constant 0 : index
    %c0_6 = arith.constant 0 : index
    %4 = vector.load %arg4[%c0_5, %c0_6] : memref<4x4xf32, #tpu.memory_space<vmem>>, vector<4x4xf32>
    %cst = arith.constant dense<0.000000e+00> : vector<4x256xf32>
    %5 = tpu.matmul %4, %1, %cst {dimension_numbers = #tpu.dot_dimension_numbers<[1], [0], [0], [1], [0, 0, 1, 1], [], []>} : vector<4x4xf32>, vector<4x256xf32>, vector<4x256xf32> -> vector<4x256xf32>
    %c0_7 = arith.constant 0 : index
    %c0_8 = arith.constant 0 : index
    %6 = vector.load %arg5[%c0_7, %c0_8] : memref<4x1xf32, #tpu.memory_space<vmem>>, vector<4x1xf32>
    %7 = vector.broadcast %6 : vector<4x1xf32> to vector<4x256xf32>
    %8 = arith.addf %5, %7 : vector<4x256xf32>
    %c0_9 = arith.constant 0 : index
    %c0_10 = arith.constant 0 : index
    %9 = vector.load %arg6[%c0_9, %c0_10] : memref<4x4xf32, #tpu.memory_space<vmem>>, vector<4x4xf32>
    %cst_11 = arith.constant dense<0.000000e+00> : vector<4x256xf32>
    %10 = tpu.matmul %9, %1, %cst_11 {dimension_numbers = #tpu.dot_dimension_numbers<[1], [0], [0], [1], [0, 0, 1, 1], [], []>} : vector<4x4xf32>, vector<4x256xf32>, vector<4x256xf32> -> vector<4x256xf32>
    %c0_12 = arith.constant 0 : index
    %c0_13 = arith.constant 0 : index
    %11 = vector.load %arg7[%c0_12, %c0_13] : memref<4x1xf32, #tpu.memory_space<vmem>>, vector<4x1xf32>
    %12 = vector.broadcast %11 : vector<4x1xf32> to vector<4x256xf32>
    %13 = arith.addf %10, %12 : vector<4x256xf32>
    %14 = arith.negf %8 : vector<4x256xf32>
    %15 = math.exp %14 : vector<4x256xf32>
    %cst_14 = arith.constant 1.000000e+00 : f32
    %16 = vector.broadcast %cst_14 : f32 to vector<4x256xf32>
    %17 = arith.addf %16, %15 : vector<4x256xf32>
    %18 = arith.divf %16, %17 : vector<4x256xf32>
    %19 = math.tanh %13 : vector<4x256xf32>
    %20 = arith.mulf %18, %19 : vector<4x256xf32>
    %c0_15 = arith.constant 0 : index
    %c0_16 = arith.constant 0 : index
    %21 = vector.load %arg8[%c0_15, %c0_16] : memref<4x4xf32, #tpu.memory_space<vmem>>, vector<4x4xf32>
    %cst_17 = arith.constant dense<0.000000e+00> : vector<4x256xf32>
    %22 = tpu.matmul %21, %1, %cst_17 {dimension_numbers = #tpu.dot_dimension_numbers<[1], [0], [0], [1], [0, 0, 1, 1], [], []>} : vector<4x4xf32>, vector<4x256xf32>, vector<4x256xf32> -> vector<4x256xf32>
    %c0_18 = arith.constant 0 : index
    %c0_19 = arith.constant 0 : index
    %23 = vector.load %arg10[%c0_18, %c0_19] : memref<4x4xf32, #tpu.memory_space<vmem>>, vector<4x4xf32>
    %cst_20 = arith.constant dense<0.000000e+00> : vector<4x256xf32>
    %24 = tpu.matmul %23, %3, %cst_20 {dimension_numbers = #tpu.dot_dimension_numbers<[1], [0], [0], [1], [0, 0, 1, 1], [], []>} : vector<4x4xf32>, vector<4x256xf32>, vector<4x256xf32> -> vector<4x256xf32>
    %25 = arith.addf %22, %24 : vector<4x256xf32>
    %c0_21 = arith.constant 0 : index
    %c0_22 = arith.constant 0 : index
    %26 = vector.load %arg9[%c0_21, %c0_22] : memref<4x1xf32, #tpu.memory_space<vmem>>, vector<4x1xf32>
    %27 = vector.broadcast %26 : vector<4x1xf32> to vector<4x256xf32>
    %28 = arith.addf %25, %27 : vector<4x256xf32>
    %29 = arith.negf %28 : vector<4x256xf32>
    %30 = math.exp %29 : vector<4x256xf32>
    %cst_23 = arith.constant 1.000000e+00 : f32
    %31 = vector.broadcast %cst_23 : f32 to vector<4x256xf32>
    %32 = arith.addf %31, %30 : vector<4x256xf32>
    %33 = arith.divf %31, %32 : vector<4x256xf32>
    %34 = arith.mulf %33, %3 : vector<4x256xf32>
    %35 = arith.addf %34, %20 : vector<4x256xf32>
    %c0_24 = arith.constant 0 : index
    %c0_25 = arith.constant 0 : index
    %36 = vector.load %arg11[%c0_24, %c0_25] : memref<4x4xf32, #tpu.memory_space<vmem>>, vector<4x4xf32>
    %cst_26 = arith.constant dense<0.000000e+00> : vector<4x256xf32>
    %37 = tpu.matmul %36, %35, %cst_26 {dimension_numbers = #tpu.dot_dimension_numbers<[1], [0], [0], [1], [0, 0, 1, 1], [], []>} : vector<4x4xf32>, vector<4x256xf32>, vector<4x256xf32> -> vector<4x256xf32>
    %c0_27 = arith.constant 0 : index
    %c0_28 = arith.constant 0 : index
    %38 = vector.load %arg12[%c0_27, %c0_28] : memref<4x1xf32, #tpu.memory_space<vmem>>, vector<4x1xf32>
    %39 = vector.broadcast %38 : vector<4x1xf32> to vector<4x256xf32>
    %40 = arith.addf %37, %39 : vector<4x256xf32>
    %c0_29 = arith.constant 0 : index
    %c0_30 = arith.constant 0 : index
    %c0_31 = arith.constant 0 : index
    %41 = vector.load %arg13[%c0_29, %c0_30, %c0_31] : memref<1x4x256xf32, #tpu.memory_space<vmem>>, vector<1x4x256xf32>
    %42 = vector.shape_cast %41 : vector<1x4x256xf32> to vector<4x256xf32>
    %43 = vector.shape_cast %40 : vector<4x256xf32> to vector<1x4x256xf32>
    tpu.vector_store %arg13[%c0_29, %c0_30, %c0_31], %43 {strides = array<i32>} : memref<1x4x256xf32, #tpu.memory_space<vmem>>, vector<1x4x256xf32>,
    return
  }
  func.func @transform_0(%arg0: i32, %arg1: i32) -> (i32, i32, i32) {
    %c0_i32 = arith.constant 0 : i32
    %c0_i32_0 = arith.constant 0 : i32
    return %arg0, %c0_i32, %arg1 : i32, i32, i32
  }
  func.func @transform_1(%arg0: i32, %arg1: i32) -> (i32, i32, i32) {
    %c0_i32 = arith.constant 0 : i32
    %c0_i32_0 = arith.constant 0 : i32
    return %arg0, %c0_i32, %arg1 : i32, i32, i32
  }
  func.func @transform_2(%arg0: i32, %arg1: i32) -> (i32, i32) {
    %c0_i32 = arith.constant 0 : i32
    %c0_i32_0 = arith.constant 0 : i32
    %c0_i32_1 = arith.constant 0 : i32
    return %c0_i32, %c0_i32_0 : i32, i32
  }
  func.func @transform_3(%arg0: i32, %arg1: i32) -> (i32, i32) {
    %c0_i32 = arith.constant 0 : i32
    %c0_i32_0 = arith.constant 0 : i32
    %c0_i32_1 = arith.constant 0 : i32
    return %c0_i32, %c0_i32_0 : i32, i32
  }
  func.func @transform_4(%arg0: i32, %arg1: i32) -> (i32, i32) {
    %c0_i32 = arith.constant 0 : i32
    %c0_i32_0 = arith.constant 0 : i32
    %c0_i32_1 = arith.constant 0 : i32
    return %c0_i32, %c0_i32_0 : i32, i32
  }
  func.func @transform_5(%arg0: i32, %arg1: i32) -> (i32, i32) {
    %c0_i32 = arith.constant 0 : i32
    %c0_i32_0 = arith.constant 0 : i32
    %c0_i32_1 = arith.constant 0 : i32
    return %c0_i32, %c0_i32_0 : i32, i32
  }
  func.func @transform_6(%arg0: i32, %arg1: i32) -> (i32, i32) {
    %c0_i32 = arith.constant 0 : i32
    %c0_i32_0 = arith.constant 0 : i32
    %c0_i32_1 = arith.constant 0 : i32
    return %c0_i32, %c0_i32_0 : i32, i32
  }
  func.func @transform_7(%arg0: i32, %arg1: i32) -> (i32, i32) {
    %c0_i32 = arith.constant 0 : i32
    %c0_i32_0 = arith.constant 0 : i32
    %c0_i32_1 = arith.constant 0 : i32
    return %c0_i32, %c0_i32_0 : i32, i32
  }
  func.func @transform_8(%arg0: i32, %arg1: i32) -> (i32, i32) {
    %c0_i32 = arith.constant 0 : i32
    %c0_i32_0 = arith.constant 0 : i32
    %c0_i32_1 = arith.constant 0 : i32
    return %c0_i32, %c0_i32_0 : i32, i32
  }
  func.func @transform_9(%arg0: i32, %arg1: i32) -> (i32, i32) {
    %c0_i32 = arith.constant 0 : i32
    %c0_i32_0 = arith.constant 0 : i32
    %c0_i32_1 = arith.constant 0 : i32
    return %c0_i32, %c0_i32_0 : i32, i32
  }
  func.func @transform_10(%arg0: i32, %arg1: i32) -> (i32, i32) {
    %c0_i32 = arith.constant 0 : i32
    %c0_i32_0 = arith.constant 0 : i32
    %c0_i32_1 = arith.constant 0 : i32
    return %c0_i32, %c0_i32_0 : i32, i32
  }
  func.func @transform_11(%arg0: i32, %arg1: i32) -> (i32, i32, i32) {
    %c0_i32 = arith.constant 0 : i32
    %c0_i32_0 = arith.constant 0 : i32
    return %arg0, %c0_i32, %arg1 : i32, i32, i32
  }
}

</mosaic_0001>

<bundles_post_ra>
// kernel: tpu_custom_call.1
= control target key start
LH: loop header
LB: loop body
LE: loop exit
PB: predicated region body
PF: predicated region fallthrough
CT: control target
= control target key end

     0   :  { %s1530_s0 = inlined_call_operand.hbm [shape: f32[2,4,256], index: 0, kind: input, shape index: {}]   ;;  %s1531_s1 = inlined_call_operand.hbm [shape: f32[2,4,256], index: 1, kind: input, shape index: {}]   ;;  %s1532_s2 = inlined_call_operand.vmem [shape: f32[4,4], index: 2, kind: input, shape index: {}]   ;;  %s1533_s3 = inlined_call_operand.vmem [shape: f32[4,1], index: 3, kind: input, shape index: {}]   ;;  %s1534_s4 = inlined_call_operand.vmem [shape: f32[4,4], index: 4, kind: input, shape index: {}]   ;;  %s1535_s5 = inlined_call_operand.vmem [shape: f32[4,1], index: 5, kind: input, shape index: {}]   ;;  %s1536_s6 = inlined_call_operand.vmem [shape: f32[4,4], index: 6, kind: input, shape index: {}]   ;;  %s1537_s7 = inlined_call_operand.vmem [shape: f32[4,1], index: 7, kind: input, shape index: {}]   ;;  %s1538_s8 = inlined_call_operand.vmem [shape: f32[4,4], index: 8, kind: input, shape index: {}]   ;;  %s1539_s9 = inlined_call_operand.vmem [shape: f32[4,4], index: 9, kind: input, shape index: {}]   ;;  %s1540_s10 = inlined_call_operand.vmem [shape: f32[4,1], index: 10, kind: input, shape index: {}]   ;;  %s1541_s11 = inlined_call_operand.hbm [shape: f32[2,4,256], index: 11, kind: output, shape index: {}]  }
   0x1   :  { %1550 = sst [smem:[#allocation18_spill]] %s1541_s11 }
   0x2   :  { %16 = vsyncpa [#allocation3], 0 }
   0x3   :  { %18 = vsyncpa [#allocation3 + $0x1], 0 }
   0x4   :  { %19 = vsyncpa [#allocation6], 0 }
   0x5   :  { %21 = vsyncpa [#allocation6 + $0x1], 0 }
   0x6   :  { %22 = vsyncpa [#allocation4], 0 }
   0x7   :  { %24 = vsyncpa [#allocation4 + $0x1], 0  ;;  %s1325_s17 = smov 0   ;;  %s1327_s18 = smov 0  }
   0x8   :  { %s1329_s19 = smov 0   ;;  %s1331_s20 = smov 0  }
   0x9   :  { %s1333_s21 = smov 0   ;;  %s1335_s22 = smov 0  }
   0xa LB: > { %1551 = sst [smem:[#allocation11_spill]] %s1242_s17  ;;  %s980_s23 = sadd.s32 4294967295, %s1262_s22   ;;  %s1262_s22 = sphi %s1335_s22, %s30_s22   ;;  %s1258_s21 = sphi %s1333_s21, %s1577_s21   ;;  %s1254_s20 = sphi %s1331_s20, %s1576_s20   ;;  %s1250_s19 = sphi %s1329_s19, %s1575_s19   ;;  %s1246_s18 = sphi %s1327_s18, %s1579_s18   ;;  %s1242_s17 = sphi %s1325_s17, %s1578_s17  }
   0xb   : > { %1552 = sst [smem:[#allocation12_spill]] %s1250_s19  ;;  %s981_s24 = sadd.s32 4294967294, %s1262_s22  }
   0xc   : > { %1553 = sst [smem:[#allocation13_spill]] %s1258_s21  ;;  %s42_s25 = sadd.s32 1, %s1258_s21 }
   0xd   : > { %s51_s26 = sadd.s32 1, %s1250_s19  ;;  %p44_p0 = scmp.ge.s32.totalorder %s42_s25, 2 }
   0xe   : > { %p58_p1 = scmp.ne.s32.totalorder %s1250_s19, %s1246_s18  ;;  %p59_p2 = scmp.eq.s32.totalorder %s1262_s22, 0 }
   0xf   : > { %p64_p3 = scmp.ne.s32.totalorder %s1246_s18, %s1242_s17  ;;  %s1581_s25 = smov (%p44_p0, %s42_s25), 0 }
  0x10   : > { %1554 = sst [smem:[#allocation14_spill]] %s1581_s25  ;;  %p1366_p4 = por %p59_p2, %p58_p1 }
  0x11   : > { %p65_p5 = scmp.eq.s32.totalorder %s980_s23, 0  ;;  %s46_s28 = ssub.s32 %s1258_s21, %s1581_s25 }
  0x12   : > { %p307_p6 = scmp.eq.s32.totalorder %s980_s23, 1  ;;  %p49_p7 = scmp.eq.s32.totalorder %s46_s28, 0 }
  0x13   : > { %p1372_p8 = por %p65_p5, %p64_p3  ;;  %p313_p10 = scmp.eq.s32.totalorder %s981_s24, 1 }
  0x14   : > { %p1376_p9 = por %p307_p6, %p58_p1  ;;  %p983_p12 = scmp.ge.s32.totalorder %s1262_s22, 2 }
  0x15   : > { %s1381_s12 = scalar_select %p49_p7, %s1250_s19, %s51_s26  }
  0x16   : > { %s1557_s30 = scalar_select %p1376_p9, 1, 0 }
  0x17   : > { %1559 = sst [smem:[#allocation16_spill]] %s1381_s12  ;;  %p1383_p11 = por %p313_p10, %p64_p3 }
  0x18   : > { %1558 = sst [smem:[#allocation15_spill]] %s1557_s30  ;;  %p1043_p13 = scmp.lt.s32.totalorder %s1262_s22, 2 }
  0x19   : > { %s1560_s13 = scalar_select %p1383_p11, 1, 0 }
  0x1a   : > { %s360_s14 = sand.u32 1, %s1250_s19   ;;  %s1023_s16 = sshll.u32 %s1258_s21, 3 }
  0x1b   : > { %1561 = sst [smem:[#allocation17_spill]] %s1560_s13  ;;  %s984_s15 = sshll.u32 %s360_s14, 3 }
  0x1c   : > { %s371_s25 = scalar_lea.hbm %s1530_s0, %s1023_s16  ;;  %s364_s17 = scalar_lea.vmem [#allocation2], %s984_s15 }
  0x1d   : > { %s375_s30 = sshll.u32 %s364_s17, 4  ;;  %s373_s11 = sshll.u32 %s371_s25, 4  ;;  %s376_s30 = int_to_ptr.vmem [resolvable:$true] %s375_s30  ;;  %s374_s11 = int_to_ptr.hbm [resolvable:$true] %s373_s11 }
  0x1e   : > { %p1033_p0 = pnand %p1043_p13, %p1366_p4  ;;  %p990_p1 = scmp.ge.s32.totalorder %s1262_s22, 1 }
  0x1f   : > { %p402_p2 = scmp.lt.s32.totalorder %s1262_s22, 3  ;;  %s361_s24 = scalar_lea.sflag [#allocation3], %s360_s14 }
  0x20   : > { %1035 = dma.hbm_to_vmem [thread:$0]  (!%p1033_p0), %s374_s11, 128, %s376_s30, %s361_s24  }
  0x21   : > { %p403_p3 = pnand %p990_p1, %p402_p2  ;;  %s393_s21 = scalar_lea.hbm %s1531_s1, %s1023_s16 }
  0x22   : > { %s386_s19 = scalar_lea.vmem [#allocation5], %s984_s15  ;;  %s395_s23 = sshll.u32 %s393_s21, 4  ;;  %s396_s23 = int_to_ptr.hbm [resolvable:$true] %s395_s23 }
  0x23   : > { %s397_s13 = sshll.u32 %s386_s19, 4  ;;  %s383_s17 = scalar_lea.sflag [#allocation6], %s360_s14  ;;  %s398_s13 = int_to_ptr.vmem [resolvable:$true] %s397_s13 }
  0x24   : > { %1038 = dma.hbm_to_vmem [thread:$0]  (!%p1033_p0), %s396_s23, 128, %s398_s13, %s383_s17  }
  0x25   : > { %406 = sbr.rel (%p403_p3) target bundleno = 383 (0x17f), region = 64  ;;  %s1402_s25 = sand.u32 (!%p403_p3), 1, %s1246_s18  }
  0x26   : > { %s1405_s11 = sshll.u32 (!%p403_p3), %s1402_s25, 3  ;;  %s409_s27 = scalar_lea.sflag (!%p403_p3), [#allocation3], %s1402_s25 }
  0x27   : > { %s412_s30 = scalar_lea.vmem (!%p403_p3), [#allocation2], %s1405_s11 }
  0x2a   : > { %1229 = dma.done.wait (%p1372_p8), %s409_s27, 128  }
  0x2b   : > { %1231 = vsyncadd (%p1372_p8), %s409_s27, 4294967168  ;;  %s419_s19 = scalar_lea.sflag [#allocation6], %s1402_s25  ;;  %s422_s21 = scalar_lea.vmem [#allocation5], %s1405_s11 }
  0x2c   : > { %1233 = dma.done.wait (%p1372_p8), %s419_s19, 128  }
  0x2d   : > { %1235 = vsyncadd (%p1372_p8), %s419_s19, 4294967168  ;;  %v1264_v0 = vmov 0   ;;  %v470_v1 = vld [vmem:[%s412_s30] sm:$0xff]  ;;  %v473_v2 = vld [vmem:[%s1533_s3] sm:$0xf]  ;;  %vm487_vm0 = vcmask 1043456  }
  0x2e   : > { %1094 = vset.pattern.permute.xlu0 %v1264_v0  ;;  %1095 = vset.pattern.permute.xlu1 %v1264_v0  ;;  %480 = vst [vmem:[#allocation1] ss:$2 sm:$0xff] %v470_v1  ;;  %v533_v3 = vld [vmem:[%s1535_s5] sm:$0xf]  ;;  %vm483_vm1 = vcmask 31744   ;;  %s1025_s15 = sshll.u32 %s1254_s20, 3 }
  0x2f   : > { %476 = vperm.xlu0 %1094, %v473_v2   ;;  %536 = vperm.xlu1 %1095, %v533_v3   ;;  %v472_v4 = vld [vmem:[%s1532_s2] sm:$0xf]  ;;  %s1570_s28 = sld [smem:[#allocation18_spill]]  ;;  %s466_s23 = scalar_lea.vmem [#allocation7], %s1405_s11 }
  0x30   : > { %v734_v5 = vld [vmem:[%s1537_s7] sm:$0xf]  ;;  %s867_s17 = sshll.u32 %s466_s23, 4  ;;  %s852_s20 = scalar_lea.sflag [#allocation4], %s1402_s25  ;;  %s868_s17 = int_to_ptr.vmem [resolvable:$true] %s867_s17 }
  0x31   : > { %v790_v6 = vld [vmem:[%s1540_s10] sm:$0xf] }
  0x32   : > { %v471_v9 = vld [vmem:[%s422_s21] sm:$0xff] }
  0x33   : > { %v532_v10 = vld [vmem:[%s1534_s4] sm:$0xf] }
  0x34   : > { %v632_v13 = vld [vmem:[%s1538_s8] sm:$0xf] }
  0x35   : > { %v482_v7 = vld.sshfl [vmem:[#allocation1 + $0x8] sm:$0xff pattern:$0x75316420]  ;;  %v481_v8 = vld.sshfl [vmem:[#allocation1] sm:$0xff pattern:$0x75316420]  ;;  %s865_s24 = scalar_lea.hbm %s1570_s28, %s1025_s15 }
  0x36   : > { %996 = vmatpush.msk.msra.mxu1 %vm487_vm0, %v482_v7  ;;  %994 = vmatpush.msk.msra.mxu0 %vm487_vm0, %v481_v8  ;;  %539 = vst [vmem:[#allocation1] ss:$2 sm:$0xff] %v470_v1  ;;  %v631_v16 = vld [vmem:[%s1536_s6] sm:$0xf]  ;;  %s869_s27 = sshll.u32 %s865_s24, 4  ;;  %s1196_s11 = scalar_lea.hbm %s1570_s28, 16  ;;  %s870_s27 = int_to_ptr.hbm [resolvable:$true] %s869_s27 }
  0x37   : > { %997 = vmatmul.msk.f32.vlgmr.msra.gmra.mxu1 %vm483_vm1, %v472_v4  ;;  %995 = vmatmul.msk.f32.vlgmr.msra.gmra.mxu0 %vm483_vm1, %v472_v4  ;;  %s1190_s30 = sshra.s32 %s870_s27, 4  ;;  %s1191_s30 = int_to_ptr.hbm [resolvable:$true] %s1190_s30 }
  0x38   : > { %737 = vperm.xlu0 %1094, %v734_v5   ;;  %793 = vperm.xlu1 %1095, %v790_v6   ;;  %s1192_s19 = scalar_lea.hbm %s1191_s30, 8  ;;  %p1197_p7 = scmp.lt.s32.totalorder %s1191_s30, %s1570_s28 }
  0x39   : > { %p1193_p4 = scmp.ne.s32.totalorder %s1191_s30, %s1192_s19  ;;  %p1198_p8 = scmp.lt.s32.totalorder %s1196_s11, %s1192_s19 }
  0x3b   : > { %p1194_p5 = pnand %p1193_p4, %p1376_p9  ;;  %p1199_p10 = por %p1198_p8, %p1197_p7 }
  0x3d   : > { %v540_v11 = vld.sshfl [vmem:[#allocation1] sm:$0xff pattern:$0x75316420]  ;;  %v541_v12 = vld.sshfl [vmem:[#allocation1 + $0x8] sm:$0xff pattern:$0x75316420]  ;;  %p1195_p6 = pneg %p1194_p5 }
  0x3e   : > { %998 = vmatpush.msk.msra.mxu2 %vm487_vm0, %v540_v11  ;;  %1000 = vmatpush.msk.msra.mxu3 %vm487_vm0, %v541_v12  ;;  %634 = vst [vmem:[#allocation1] ss:$2 sm:$0xff] %v471_v9 }
  0x3f   : > { %999 = vmatmul.msk.f32.vlgmr.msra.gmra.mxu2 %vm483_vm1, %v532_v10  ;;  %1001 = vmatmul.msk.f32.vlgmr.msra.gmra.mxu3 %vm483_vm1, %v532_v10  ;;  %p1200_p13 = pnand %p1199_p10, %p1195_p6 }
  0x45   : > { %v635_v14 = vld.sshfl [vmem:[#allocation1] sm:$0xff pattern:$0x75316420]  ;;  %v636_v15 = vld.sshfl [vmem:[#allocation1 + $0x8] sm:$0xff pattern:$0x75316420] }
  0x46   : > { %684 = vst [vmem:[#allocation1] ss:$2 sm:$0xff] %v470_v1  ;;  %1004 = vmatpush.msk.msrb.mxu0 %vm487_vm0, %v635_v14  ;;  %1006 = vmatpush.msk.msrb.mxu1 %vm487_vm0, %v636_v15 }
  0x47   : > { %1005 = vmatmul.msk.f32.vlgmr.msrb.gmra.mxu0 %vm483_vm1, %v632_v13  ;;  %1007 = vmatmul.msk.f32.vlgmr.msrb.gmra.mxu1 %vm483_vm1, %v632_v13 }
  0x4d   : > { %v685_v17 = vld.sshfl [vmem:[#allocation1] sm:$0xff pattern:$0x75316420]  ;;  %v686_v18 = vld.sshfl [vmem:[#allocation1 + $0x8] sm:$0xff pattern:$0x75316420] }
  0x4e   : > { %1008 = vmatpush.msk.msrb.mxu2 %vm487_vm0, %v685_v17  ;;  %1010 = vmatpush.msk.msrb.mxu3 %vm487_vm0, %v686_v18  ;;  %780 = vst [vmem:[#allocation1] ss:$2 sm:$0xff] %v471_v9 }
  0x4f   : > { %1009 = vmatmul.msk.f32.vlgmr.msrb.gmra.mxu2 %vm483_vm1, %v631_v16  ;;  %1011 = vmatmul.msk.f32.vlgmr.msrb.gmra.mxu3 %vm483_vm1, %v631_v16 }
  0xa1   : > { %v477_v20 = vpop.permute.xlu0 %476  ;;  %v537_v53 = vpop.permute.xlu1 %536 }
  0xaa   : > { %v738_v38 = vpop.permute.xlu0 %737 }
  0xb4   : > { %v509_v19 = vpop.f32.mrf.mxu0  ;;  %v529_v21 = vpop.f32.mrf.mxu1 }
  0xb5   : > { %v510_v22 = vadd.f32 %v509_v19, %v477_v20  ;;  %v530_v23 = vadd.f32 %v529_v21, %v477_v20 }
  0xb7   : > { %v1002_v24 = vmul.f32 -1.442695, %v510_v22  ;;  %v1003_v25 = vmul.f32 -1.442695, %v530_v23 }
  0xb9   : > { %1096 = vpow2.f32 %v1002_v24  ;;  %v781_v24 = vld.sshfl [vmem:[#allocation1] sm:$0xff pattern:$0x75316420] }
  0xba   : > { %1098 = vpow2.f32 %v1003_v25 }
  0xbf   : > { %v1097_v28 = vpop.eup %1096 }
  0xc0   : > { %v1099_v29 = vpop.eup %1098  ;;  %v595_v30 = vadd.f32 1.0, %v1097_v28 }
  0xc1   : > { %v596_v33 = vadd.f32 1.0, %v1099_v29 }
  0xc2   : > { %v566_v26 = vpop.f32.mrf.mxu2  ;;  %v586_v27 = vpop.f32.mrf.mxu3  ;;  %1100 = vrcp.f32 %v595_v30  ;;  %vm602_vm2 = vweird.f32 %v595_v30  ;;  %v606_v58 = vand.u32 2147483647, %v595_v30  ;;  %v608_v63 = vand.u32 2147483648, %v595_v30 }
  0xc3   : > { %1102 = vrcp.f32 %v596_v33  ;;  %v621_v55 = vand.u32 2147483647, %v596_v33  ;;  %v567_v56 = vadd.f32 %v566_v26, %v537_v53  ;;  %v587_v59 = vadd.f32 %v586_v27, %v537_v53 }
  0xc4   : > { %v661_v31 = vpop.f32.mrf.mxu0  ;;  %v681_v32 = vpop.f32.mrf.mxu1  ;;  %v623_v60 = vand.u32 2147483648, %v596_v33  ;;  %vm617_vm4 = vweird.f32 %v596_v33  ;;  %vm1467_vm8 = vcmp.eq.f32.partialorder %v606_v58, 8.507059e+37  ;;  %v609_v11 = vor.u32 1.1754944e-38, %v608_v63 }
  0xc5   : > { %vm1463_vm7 = vcmp.eq.f32.partialorder %v621_v55, 8.507059e+37 }
  0xc6   : > { %v624_v8 = vor.u32 1.1754944e-38, %v623_v60 }
  0xc8   : > { %v1101_v43 = vpop.eup %1100 }
  0xc9   : > { %v1103_v44 = vpop.eup %1102  ;;  %v598_v45 = vmul.f32 %v1101_v43, %v595_v30  ;;  %vm603_vm3 = vweird.f32 %v1101_v43  ;;  %v782_v30 = vld.sshfl [vmem:[#allocation1 + $0x8] sm:$0xff pattern:$0x75316420] }
  0xca   : > { %v613_v46 = vmul.f32 %v1103_v44, %v596_v33  ;;  %vm618_vm5 = vweird.f32 %v1103_v44  ;;  %vm1459_vm6 = vmor %vm602_vm2, %vm603_vm3 }
  0xcb   : > { %v599_v49 = vsub.f32 1.0, %v598_v45  ;;  %vm1471_vm9 = vmor %vm617_vm4, %vm618_vm5 }
  0xcc   : > { %v614_v52 = vsub.f32 1.0, %v613_v46 }
  0xcd   : > { %v600_v54 = vmul.f32 %v1101_v43, %v599_v49 }
  0xce   : > { %v615_v57 = vmul.f32 %v1103_v44, %v614_v52 }
  0xcf   : > { %v601_v62 = vadd.f32 %v1101_v43, %v600_v54 }
  0xd0   : > { %v616_v3 = vadd.f32 %v1103_v44, %v615_v57 }
  0xd1   : > { %v605_v10 = vsel %vm1459_vm6, %v1101_v43, %v601_v62 }
  0xd2   : > { %v711_v34 = vpop.f32.mrf.mxu2  ;;  %v731_v35 = vpop.f32.mrf.mxu3  ;;  %v620_v17 = vsel %vm1471_vm9, %v1103_v44, %v616_v3  ;;  %v610_v22 = vsel %vm1467_vm8, %v609_v11, %v605_v10 }
  0xd3   : > { %v712_v36 = vadd.f32 %v711_v34, %v661_v31  ;;  %v732_v37 = vadd.f32 %v731_v35, %v681_v32  ;;  %v625_v27 = vsel %vm1463_vm7, %v624_v8, %v620_v17 }
  0xd5   : > { %v740_v39 = vadd.f32 %v738_v38, %v712_v36  ;;  %v741_v40 = vadd.f32 %v738_v38, %v732_v37 }
  0xd7   : > { %v1012_v41 = vmul.f32 -1.442695, %v740_v39  ;;  %v1013_v42 = vmul.f32 -1.442695, %v741_v40  ;;  %v789_v39 = vld [vmem:[%s1539_s9] sm:$0xf] }
  0xd9   : > { %1104 = vpow2.f32 %v1012_v41  ;;  %v794_v41 = vpop.permute.xlu1 %793 }
  0xda   : > { %1106 = vpow2.f32 %v1013_v42 }
  0xdf   : > { %v1105_v47 = vpop.eup %1104 }
  0xe0   : > { %v1107_v48 = vpop.eup %1106  ;;  %v748_v50 = vadd.f32 1.0, %v1105_v47 }
  0xe1   : > { %v749_v51 = vadd.f32 1.0, %v1107_v48 }
  0xe2   : > { %1108 = vrcp.f32 %v748_v50  ;;  %v761_v12 = vand.u32 2147483648, %v748_v50  ;;  %v759_v16 = vand.u32 2147483647, %v748_v50  ;;  %vm755_vm12 = vweird.f32 %v748_v50 }
  0xe3   : > { %1110 = vrcp.f32 %v749_v51  ;;  %v776_v15 = vand.u32 2147483648, %v749_v51  ;;  %v774_v19 = vand.u32 2147483647, %v749_v51  ;;  %vm770_vm14 = vweird.f32 %v749_v51 }
  0xe4   : > { %1112 = vtanh.f32 %v567_v56  ;;  %v762_v23 = vor.u32 1.1754944e-38, %v761_v12  ;;  %vm760_vm2 = vcmp.eq.f32.partialorder %v759_v16, 8.507059e+37 }
  0xe5   : > { %1114 = vtanh.f32 %v587_v59  ;;  %v777_v28 = vor.u32 1.1754944e-38, %v776_v15  ;;  %vm775_vm3 = vcmp.eq.f32.partialorder %v774_v19, 8.507059e+37 }
  0xe8   : > { %v1109_v61 = vpop.eup %1108 }
  0xe9   : > { %v1111_v0 = vpop.eup %1110  ;;  %v751_v2 = vmul.f32 %v1109_v61, %v748_v50  ;;  %vm756_vm10 = vweird.f32 %v1109_v61 }
  0xea   : > { %v766_v5 = vmul.f32 %v1111_v0, %v749_v51  ;;  %vm771_vm11 = vweird.f32 %v1111_v0  ;;  %v1113_v21 = vpop.eup %1112  ;;  %vm757_vm13 = vmor %vm755_vm12, %vm756_vm10 }
  0xeb   : > { %v752_v9 = vsub.f32 1.0, %v751_v2  ;;  %v1115_v26 = vpop.eup %1114  ;;  %vm772_vm15 = vmor %vm770_vm14, %vm771_vm11  ;;  %v629_v33 = vmul.f32 %v1113_v21, %v610_v22 }
  0xec   : > { %v767_v13 = vsub.f32 1.0, %v766_v5  ;;  %v630_v36 = vmul.f32 %v1115_v26, %v625_v27 }
  0xed   : > { %v753_v14 = vmul.f32 %v1109_v61, %v752_v9 }
  0xee   : > { %v768_v18 = vmul.f32 %v1111_v0, %v767_v13 }
  0xef   : > { %v754_v20 = vadd.f32 %v1109_v61, %v753_v14 }
  0xf0   : > { %v769_v25 = vadd.f32 %v1111_v0, %v768_v18 }
  0xf1   : > { %v758_v29 = vsel %vm757_vm13, %v1109_v61, %v754_v20 }
  0xf2   : > { %v763_v31 = vsel %vm760_vm2, %v762_v23, %v758_v29  ;;  %v773_v32 = vsel %vm772_vm15, %v1111_v0, %v769_v25 }
  0xf3   : > { %v785_v34 = vmul.f32 %v781_v24, %v763_v31  ;;  %v778_v35 = vsel %vm775_vm3, %v777_v28, %v773_v32 }
  0xf4   : > { %v786_v37 = vmul.f32 %v782_v30, %v778_v35 }
  0xf5   : > { %v787_v38 = vadd.f32 %v785_v34, %v629_v33 }
  0xf6   : > { %v788_v40 = vadd.f32 %v786_v37, %v630_v36 }
  0xf7   : > { %1014 = vmatpush.msk.msra.mxu0 %vm487_vm0, %v787_v38 }
  0xf8   : > { %1016 = vmatpush.msk.msra.mxu1 %vm487_vm0, %v788_v40  ;;  %1015 = vmatmul.msk.f32.vlgmr.msra.gmra.mxu0 %vm483_vm1, %v789_v39 }
  0xf9   : > { %1017 = vmatmul.msk.f32.vlgmr.msra.gmra.mxu1 %vm483_vm1, %v789_v39 }
 0x175   : > { %v822_v42 = vpop.f32.mrf.mxu0 }
 0x176   : > { %v842_v43 = vpop.f32.mrf.mxu1  ;;  %v823_v45 = vadd.f32 %v822_v42, %v794_v41 }
 0x177   : > { %v843_v44 = vadd.f32 %v842_v43, %v794_v41 }
 0x179   : > { %v847_v46 = vrot.slane %v843_v44, 4 }
 0x17b   : > { %v848_v47 = vsel %vm487_vm0, %v823_v45, %v847_v46 }
 0x17c   : > { %850 = vst [vmem:[%s466_s23] sm:$0xff] %v848_v47 }
 0x17d   : > { %1203 = shalt.err (!%p1200_p13)
}
 0x17e   : > { %1030 = dma.vmem_to_hbm [thread:$0]  (%p1376_p9), %s868_s17, 128, %s870_s27, %s852_s20  }
 0x17f PF: > { %s1572_s25 = sld [smem:[#allocation11_spill]]  ;;  %p1040_p0 = pnand %p983_p12, %p1383_p11 }
 0x181   : > { %p1041_p1 = pneg %p1040_p0 }
 0x185   : > { %s881_s16 = sand.u32 1, %s1572_s25  }
 0x186   : > { %s882_s29 = scalar_lea.sflag [#allocation4], %s881_s16 }
 0x187   : > { %1237 = dma.done.wait (%p1041_p1), %s882_s29, 128  }
 0x188   : > { %1239 = vsyncadd (%p1041_p1), %s882_s29, 4294967168  ;;  %s30_s22 = sadd.s32 1, %s1262_s22   ;;  %s1574_s24 = sld [smem:[#allocation12_spill]] }
 0x189   : > { %p27_p2 = scmp.ge.s32.totalorder %s30_s22, 4   ;;  %s1575_s19 = sld [smem:[#allocation16_spill]] }
 0x18a   : > { %s1576_s20 = sld [smem:[#allocation13_spill]]  ;;  %s1578_s17 = smov %s1246_s18 }
 0x18b   : > { %s1577_s21 = sld [smem:[#allocation14_spill]]  ;;  %29 = sbr.rel (!%p27_p2) target bundleno = 10 (0xa), region = 122 }
 0x18e   : > { %s1579_s18 = smov %s1574_s24 }
 0x190   :  { %888 = vsyncpa [#allocation3], 1 }
 0x191   :  { %890 = vsyncpa [#allocation3 + $0x1], 1 }
 0x192   :  { %891 = vsyncpa [#allocation6], 1 }
 0x193   :  { %893 = vsyncpa [#allocation6 + $0x1], 1 }
 0x194   :  { %894 = vsyncpa [#allocation4], 1 }
 0x195   :  { %896 = vsyncpa [#allocation4 + $0x1], 1 }

</bundles_post_ra>
